<compile_context>
chip_gen: v7x
topology: tpu7x:2x2x1
jax: 0.10.0
libtpu: 0.0.40
codegen_flags: <defaults>
</compile_context>

<pallas_src>
import functools

import jax
import jax.numpy as jnp
from jax.experimental import pallas as pl
from jax.experimental.pallas import tpu as pltpu


def _round_up(n, m):
    return ((n + m - 1) // m) * m


def _mlp_block_kernel(x_ref, tcol_ref, w1x_ref, w1t_ref, b1_ref, w2_ref,
                      b2_ref, y_ref):
    """One step-block: R = TS*B rows of f(t, x) = tanh([x,t]@W1 + b1)@W2 + b2.

    Weight/bias specs use constant index_maps, so they stay resident in VMEM
    across the whole grid; only the x rows / t column / y rows stream.
    """
    # Per-row time-conditioned bias: [R, 1] * [1, HP] + [1, HP] -> [R, HP] (VPU, f32)
    bias1 = tcol_ref[...] * w1t_ref[...] + b1_ref[...]

    # [x, t] @ W1  ==  x @ W1[:D] + t * W1[D]   (concat folded into bias1).
    # MXU operands bf16, accumulation f32.
    h = jnp.tanh(
        jnp.dot(x_ref[...], w1x_ref[...], preferred_element_type=jnp.float32)
        + bias1)                                            # [R, HP] f32
    y = (jnp.dot(h.astype(jnp.bfloat16), w2_ref[...],
                 preferred_element_type=jnp.float32)
         + b2_ref[...])                                     # [R, OUT] f32
    y_ref[...] = y.astype(y_ref.dtype)


@jax.jit
def _fused_forward(ts, xs, w1x_p, w1t_p, b1_p, w2_p, b2_p):
    """Evaluate f(t_s, x_s) for all S steps with step-blocked grid."""
    S, B, D_in = xs.shape
    HP = w1x_p.shape[1]
    OUT = w2_p.shape[1]

    # ---- step blocking: amortize per-grid-step overhead & fill the MXU ----
    TS = min(S, max(1, -(-256 // B)))       # target >= 256 rows per block
    while TS < S and (TS * B) % 8 != 0:     # keep block rows sublane-aligned
        TS += 1
    NB = -(-S // TS)                        # grid length (>= 2 for big S -> v7x)
    S_pad = NB * TS
    R = TS * B                              # rows per block

    # Flatten (step, batch) -> rows; cast x to bf16 once (MXU operand dtype).
    xs_flat = xs.reshape(S * B, D_in).astype(jnp.bfloat16)
    t_col = jnp.repeat(ts.astype(jnp.float32), B).reshape(S * B, 1)
    if S_pad != S:
        pad = (S_pad - S) * B
        xs_flat = jnp.pad(xs_flat, ((0, pad), (0, 0)))
        t_col = jnp.pad(t_col, ((0, pad), (0, 0)))

    y_flat = pl.pallas_call(
        _mlp_block_kernel,
        out_shape=jax.ShapeDtypeStruct((S_pad * B, OUT), jnp.float32),
        grid=(NB,),
        in_specs=[
            pl.BlockSpec((R, D_in), lambda i: (i, 0)),    # x rows   (streamed)
            pl.BlockSpec((R, 1), lambda i: (i, 0)),       # t column (streamed)
            pl.BlockSpec((D_in, HP), lambda i: (0, 0)),   # W1x (resident)
            pl.BlockSpec((1, HP), lambda i: (0, 0)),      # W1t (resident)
            pl.BlockSpec((1, HP), lambda i: (0, 0)),      # b1  (resident)
            pl.BlockSpec((HP, OUT), lambda i: (0, 0)),    # W2  (resident)
            pl.BlockSpec((1, OUT), lambda i: (0, 0)),     # b2  (resident)
        ],
        out_specs=pl.BlockSpec((R, OUT), lambda i: (i, 0)),
        compiler_params=pltpu.CompilerParams(
            dimension_semantics=("parallel",)),   # blocks shard over 2 TCs on v7x
    )(xs_flat, t_col, w1x_p, w1t_p, b1_p, w2_p, b2_p)

    # drop step padding; output is already at logical width dim_out
    return y_flat[:S * B].reshape(S, B, OUT)


class ModelCounter:
    """JAX/Pallas equivalent of `model_counter` wrapping an MLP dynamics model."""

    def __init__(self, dim_in=32, dim_hidden=64, dim_out=32, seed=0):
        k1, k2, k3 = jax.random.split(jax.random.PRNGKey(seed), 3)
        # f32 master parameters of the wrapped MLP
        self.w1x = (jax.random.normal(k1, (dim_in, dim_hidden), jnp.float32)
                    * (1.0 / jnp.sqrt(dim_in + 1)))
        self.w1t = (jax.random.normal(k2, (1, dim_hidden), jnp.float32)
                    * (1.0 / jnp.sqrt(dim_in + 1)))
        self.b1 = jnp.zeros((1, dim_hidden), jnp.float32)
        self.w2 = (jax.random.normal(k3, (dim_hidden, dim_out), jnp.float32)
                   * (1.0 / jnp.sqrt(dim_hidden)))
        self.b2 = jnp.zeros((1, dim_out), jnp.float32)

        # Hidden width padded to 128 lanes for the MXU (tanh(0)=0 and zero W2
        # rows keep padding exact); output stays at logical width dim_out.
        HP = _round_up(max(dim_hidden, 128), 128)
        self._w1x_p = (jnp.zeros((dim_in, HP), jnp.float32)
                       .at[:, :dim_hidden].set(self.w1x).astype(jnp.bfloat16))
        self._w1t_p = jnp.zeros((1, HP), jnp.float32).at[:, :dim_hidden].set(self.w1t)
        self._b1_p = jnp.zeros((1, HP), jnp.float32).at[:, :dim_hidden].set(self.b1)
        self._w2_p = (jnp.zeros((HP, dim_out), jnp.float32)
                      .at[:dim_hidden, :].set(self.w2).astype(jnp.bfloat16))
        self._b2_p = self.b2

        self.dim_out = dim_out
        # plain Python int, mirroring `self.counter = 0` in the nn.Module
        # TODO(synk): under jit/scan/vmap the counter would need functional
        # threading; here it is a host-side attribute exactly like PyTorch's.
        self.counter = 0

    def __call__(self, t, x):
        """Single forward pass: counter += 1; return model(t, x).

        For Python loops over many steps (typical ODE-solver use), prefer
        `forward_steps`, which collapses S host dispatches into one kernel.
        """
        self.counter += 1
        ts = jnp.asarray(t, jnp.float32).reshape((1,))
        xs = x[None]
        return _fused_forward(ts, xs, self._w1x_p, self._w1t_p, self._b1_p,
                              self._w2_p, self._b2_p)[0]

    def forward_steps(self, ts, xs):
        """Fused evaluation of S forward passes in one pallas_call (counter += S)."""
        self.counter += int(ts.shape[0])
        return _fused_forward(ts, xs, self._w1x_p, self._w1t_p, self._b1_p,
                              self._w2_p, self._b2_p)


def _reference(mc, ts, xs):
    """Pure-JAX reference with the same bf16-operand / f32-accumulate matmuls."""
    w1x = mc.w1x.astype(jnp.bfloat16)
    w2 = mc.w2.astype(jnp.bfloat16)
    h = jnp.tanh(
        jnp.einsum("sbd,dh->sbh", xs.astype(jnp.bfloat16), w1x,
                   preferred_element_type=jnp.float32)
        + ts[:, None, None] * mc.w1t[None] + mc.b1[None])
    return (jnp.einsum("sbh,ho->sbo", h.astype(jnp.bfloat16), w2,
                       preferred_element_type=jnp.float32) + mc.b2[None])


if __name__ == "__main__":
    B, D_IN, D_HID, D_OUT, S = 8, 32, 64, 32, 64
    key = jax.random.PRNGKey(0)
    kx, _ = jax.random.split(key)
    xs = jax.random.normal(kx, (S, B, D_IN), jnp.float32)
    ts = jnp.linspace(0.0, 1.0, S).astype(jnp.float32)

    mc = ModelCounter(dim_in=D_IN, dim_hidden=D_HID, dim_out=D_OUT, seed=0)

    # single-call path (matches nn.Module.forward(t, x))
    y0 = jax.block_until_ready(mc(float(ts[0]), xs[0]))

    # fused multi-step path: S forward passes, step-blocked into 2 grid points
    ys = jax.block_until_ready(mc.forward_steps(ts, xs))

    y_ref = _reference(mc, ts, xs)
    assert jnp.allclose(y0, y_ref[0], atol=1e-2, rtol=1e-2), "single-call mismatch"
    assert jnp.allclose(ys, y_ref, atol=1e-2, rtol=1e-2), "fused-step mismatch"
    assert mc.counter == 1 + S, "counter mismatch"

    print("KERNEL_OK")
</pallas_src>

<mosaic_0001>
module attributes {stable_mosaic.version = 11 : i64} {
  func.func @_mlp_block_kernel(%arg0: i32, %arg1: memref<8x32xbf16, #tpu.memory_space<vmem>>, %arg2: memref<8x1xf32, #tpu.memory_space<vmem>>, %arg3: memref<32x128xbf16, #tpu.memory_space<vmem>>, %arg4: memref<1x128xf32, #tpu.memory_space<vmem>>, %arg5: memref<1x128xf32, #tpu.memory_space<vmem>>, %arg6: memref<128x32xbf16, #tpu.memory_space<vmem>>, %arg7: memref<1x32xf32, #tpu.memory_space<vmem>>, %arg8: memref<8x32xf32, #tpu.memory_space<vmem>>) attributes {dimension_semantics = [#tpu.dimension_semantics<parallel>], iteration_bounds = array<i64: 1>, scalar_prefetch = 0 : i64, scratch_operands = 0 : i64, tpu.core_type = #tpu.core_type<tc>, window_params = [{transform_indices = @transform_0, window_bounds = array<i64: 8, 32>}, {transform_indices = @transform_1, window_bounds = array<i64: 8, 1>}, {pipeline_mode = #tpu.pipeline_mode<synchronous>, transform_indices = @transform_2, window_bounds = array<i64: 32, 128>}, {pipeline_mode = #tpu.pipeline_mode<synchronous>, transform_indices = @transform_3, window_bounds = array<i64: 1, 128>}, {pipeline_mode = #tpu.pipeline_mode<synchronous>, transform_indices = @transform_4, window_bounds = array<i64: 1, 128>}, {pipeline_mode = #tpu.pipeline_mode<synchronous>, transform_indices = @transform_5, window_bounds = array<i64: 128, 32>}, {pipeline_mode = #tpu.pipeline_mode<synchronous>, transform_indices = @transform_6, window_bounds = array<i64: 1, 32>}, {transform_indices = @transform_7, window_bounds = array<i64: 8, 32>}]} {
    %c0 = arith.constant 0 : index
    %c0_0 = arith.constant 0 : index
    %0 = vector.load %arg2[%c0, %c0_0] : memref<8x1xf32, #tpu.memory_space<vmem>>, vector<8x1xf32>
    %c0_1 = arith.constant 0 : index
    %c0_2 = arith.constant 0 : index
    %1 = vector.load %arg4[%c0_1, %c0_2] : memref<1x128xf32, #tpu.memory_space<vmem>>, vector<1x128xf32>
    %2 = vector.broadcast %0 : vector<8x1xf32> to vector<8x128xf32>
    %3 = vector.broadcast %1 : vector<1x128xf32> to vector<8x128xf32>
    %4 = arith.mulf %2, %3 : vector<8x128xf32>
    %c0_3 = arith.constant 0 : index
    %c0_4 = arith.constant 0 : index
    %5 = vector.load %arg5[%c0_3, %c0_4] : memref<1x128xf32, #tpu.memory_space<vmem>>, vector<1x128xf32>
    %6 = vector.broadcast %5 : vector<1x128xf32> to vector<8x128xf32>
    %7 = arith.addf %4, %6 : vector<8x128xf32>
    %c0_5 = arith.constant 0 : index
    %c0_6 = arith.constant 0 : index
    %8 = vector.load %arg1[%c0_5, %c0_6] : memref<8x32xbf16, #tpu.memory_space<vmem>>, vector<8x32xbf16>
    %c0_7 = arith.constant 0 : index
    %c0_8 = arith.constant 0 : index
    %9 = vector.load %arg3[%c0_7, %c0_8] : memref<32x128xbf16, #tpu.memory_space<vmem>>, vector<32x128xbf16>
    %cst = arith.constant dense<0.000000e+00> : vector<8x128xf32>
    %10 = tpu.matmul %8, %9, %cst {dimension_numbers = #tpu.dot_dimension_numbers<[1], [0], [0], [1], [0, 0, 1, 1], [], []>} : vector<8x32xbf16>, vector<32x128xbf16>, vector<8x128xf32> -> vector<8x128xf32>
    %11 = arith.addf %10, %7 : vector<8x128xf32>
    %12 = math.tanh %11 : vector<8x128xf32>
    %13 = arith.truncf %12 : vector<8x128xf32> to vector<8x128xbf16>
    %c0_9 = arith.constant 0 : index
    %c0_10 = arith.constant 0 : index
    %14 = vector.load %arg6[%c0_9, %c0_10] : memref<128x32xbf16, #tpu.memory_space<vmem>>, vector<128x32xbf16>
    %cst_11 = arith.constant dense<0.000000e+00> : vector<8x32xf32>
    %15 = tpu.matmul %13, %14, %cst_11 {dimension_numbers = #tpu.dot_dimension_numbers<[1], [0], [0], [1], [0, 0, 1, 1], [], []>} : vector<8x128xbf16>, vector<128x32xbf16>, vector<8x32xf32> -> vector<8x32xf32>
    %c0_12 = arith.constant 0 : index
    %c0_13 = arith.constant 0 : index
    %16 = vector.load %arg7[%c0_12, %c0_13] : memref<1x32xf32, #tpu.memory_space<vmem>>, vector<1x32xf32>
    %17 = vector.broadcast %16 : vector<1x32xf32> to vector<8x32xf32>
    %18 = arith.addf %15, %17 : vector<8x32xf32>
    %c0_14 = arith.constant 0 : index
    %c0_15 = arith.constant 0 : index
    %19 = vector.load %arg8[%c0_14, %c0_15] : memref<8x32xf32, #tpu.memory_space<vmem>>, vector<8x32xf32>
    tpu.vector_store %arg8[%c0_14, %c0_15], %18 {strides = array<i32>} : memref<8x32xf32, #tpu.memory_space<vmem>>, vector<8x32xf32>,
    return
  }
  func.func @transform_0(%arg0: i32) -> (i32, i32) {
    %c0_i32 = arith.constant 0 : i32
    %c0_i32_0 = arith.constant 0 : i32
    return %arg0, %c0_i32 : i32, i32
  }
  func.func @transform_1(%arg0: i32) -> (i32, i32) {
    %c0_i32 = arith.constant 0 : i32
    %c0_i32_0 = arith.constant 0 : i32
    return %arg0, %c0_i32 : i32, i32
  }
  func.func @transform_2(%arg0: i32) -> (i32, i32) {
    %c0_i32 = arith.constant 0 : i32
    %c0_i32_0 = arith.constant 0 : i32
    %c0_i32_1 = arith.constant 0 : i32
    return %c0_i32, %c0_i32_0 : i32, i32
  }
  func.func @transform_3(%arg0: i32) -> (i32, i32) {
    %c0_i32 = arith.constant 0 : i32
    %c0_i32_0 = arith.constant 0 : i32
    %c0_i32_1 = arith.constant 0 : i32
    return %c0_i32, %c0_i32_0 : i32, i32
  }
  func.func @transform_4(%arg0: i32) -> (i32, i32) {
    %c0_i32 = arith.constant 0 : i32
    %c0_i32_0 = arith.constant 0 : i32
    %c0_i32_1 = arith.constant 0 : i32
    return %c0_i32, %c0_i32_0 : i32, i32
  }
  func.func @transform_5(%arg0: i32) -> (i32, i32) {
    %c0_i32 = arith.constant 0 : i32
    %c0_i32_0 = arith.constant 0 : i32
    %c0_i32_1 = arith.constant 0 : i32
    return %c0_i32, %c0_i32_0 : i32, i32
  }
  func.func @transform_6(%arg0: i32) -> (i32, i32) {
    %c0_i32 = arith.constant 0 : i32
    %c0_i32_0 = arith.constant 0 : i32
    %c0_i32_1 = arith.constant 0 : i32
    return %c0_i32, %c0_i32_0 : i32, i32
  }
  func.func @transform_7(%arg0: i32) -> (i32, i32) {
    %c0_i32 = arith.constant 0 : i32
    %c0_i32_0 = arith.constant 0 : i32
    return %arg0, %c0_i32 : i32, i32
  }
}

</mosaic_0001>

<bundles_post_ra>
// kernel: _fused_forward.1
= control target key start
LH: loop header
LB: loop body
LE: loop exit
PB: predicated region body
PF: predicated region fallthrough
CT: control target
= control target key end

     0   :  { %v334_v1 = vmov 0.0   ;;  %vm335_vm0 = vmmov 0   ;;  %v336_v5 = vmov 0   ;;  %vm67_vm1 = vcmask 261120   ;;  %s437_s0 = inlined_call_operand.vmem [shape: bf16[8,32], index: 0, kind: input, shape index: {}]   ;;  %s438_s1 = inlined_call_operand.vmem [shape: f32[8,1], index: 1, kind: input, shape index: {}]   ;;  %s439_s2 = inlined_call_operand.vmem [shape: bf16[32,128], index: 2, kind: input, shape index: {}]   ;;  %s440_s3 = inlined_call_operand.vmem [shape: f32[1,128], index: 3, kind: input, shape index: {}]   ;;  %s441_s4 = inlined_call_operand.vmem [shape: f32[1,128], index: 4, kind: input, shape index: {}]   ;;  %s442_s5 = inlined_call_operand.vmem [shape: bf16[128,32], index: 5, kind: input, shape index: {}]   ;;  %s443_s6 = inlined_call_operand.vmem [shape: f32[1,32], index: 6, kind: input, shape index: {}]   ;;  %s444_s7 = inlined_call_operand.hbm [shape: f32[8,32], index: 7, kind: output, shape index: {}]  }
   0x1   :  { %v298_v0 = vld [vmem:[%s439_s2] sm:$0xff]   ;;  %265 = vmatprep.subr.bf16.mxu0 %v334_v1  ;;  %273 = vmatprep.subr.bf16.mxu1 %v334_v1  ;;  %v299_v2 = vld [vmem:[%s439_s2 + $0x8] sm:$0xff]   ;;  %v302_v8 = vld [vmem:[%s442_s5 + $0x10] sm:$0xff]  }
   0x2   :  { %266 = vmatpush3.bf16.msra.mxu0 %v298_v0  ;;  %269 = vmatprep.mubr.msk.bf16.mxu0 %vm335_vm0, %v334_v1  ;;  %v28_v3 = vld [vmem:[%s438_s1] sm:$0xff]  ;;  %v301_v6 = vld [vmem:[%s442_s5 + $0x8] sm:$0xff]  }
   0x3   :  { %v300_v4 = vld [vmem:[%s442_s5] sm:$0xff]   ;;  %267 = vmatprep.subr.bf16.mxu0 %v334_v1  ;;  %297 = vset.pattern.permute.xlu0 %v336_v5 }
   0x4   :  { %32 = vperm.xlu0 %297, %v28_v3   ;;  %274 = vmatpush3.bf16.msra.mxu1 %v300_v4  ;;  %v50_v7 = vld [vmem:[%s437_s0] sm:$0xf] }
   0x5   :  { %275 = vmatprep.subr.bf16.mxu1 %v334_v1  ;;  %289 = vmatprep.mubr.msk.bf16.mxu1 %vm335_vm0, %v334_v1 }
   0x6   :  { %268 = vmatpush3.bf16.msra.mxu0 %v299_v2 }
   0x8   :  { %276 = vmatpush3.bf16.msra.mxu1 %v301_v6 }
   0x9   :  { %270 = vmatmul.mubr.msk.bf16.vlgmr.msra.gmra.mrb[0].mxu0 %vm67_vm1, %v50_v7  ;;  %277 = vmatprep.subr.bf16.mxu1 %v334_v1 }
   0xa   :  { %12 = vsyncpa [#allocation3], 0  ;;  %v303_v9 = vld [vmem:[%s442_s5 + $0x18] sm:$0xff]   ;;  %v304_v10 = vld [vmem:[%s442_s5 + $0x20] sm:$0xff]  }
   0xb   :  { %v305_v11 = vld [vmem:[%s442_s5 + $0x28] sm:$0xff]   ;;  %v306_v12 = vld [vmem:[%s442_s5 + $0x30] sm:$0xff]   ;;  %v307_v13 = vld [vmem:[%s442_s5 + $0x38] sm:$0xff]  }
   0xc   :  { %278 = vmatpush3.bf16.msra.mxu1 %v302_v8  ;;  %v239_v14 = vld [vmem:[%s440_s3] ss:$0 sm:$0xff]  ;;  %s337_s3 = smov [#allocation2]  }
   0xd   :  { %279 = vmatprep.subr.bf16.mxu1 %v334_v1  ;;  %v240_v17 = vld [vmem:[%s441_s4] ss:$0 sm:$0xff]  ;;  %s231_s27 = sshll.u32 %s337_s3, 4  ;;  %s232_s27 = int_to_ptr.vmem [resolvable:$true] %s231_s27 }
   0xe   :  { %v244_v26 = vld [vmem:[%s443_s6] ss:$0 sm:$0xff]  ;;  %s310_s4 = scalar_lea.vmem %s232_s27, 128  ;;  %p315_p1 = scmp.lt.s32.totalorder %s232_s27, %s232_s27 }
   0xf   :  { %p311_p0 = scmp.ne.s32.totalorder %s232_s27, %s310_s4  ;;  %p316_p2 = scmp.lt.s32.totalorder %s310_s4, %s310_s4 }
  0x10   :  { %280 = vmatpush3.bf16.msra.mxu1 %v303_v9 }
  0x11   :  { %281 = vmatprep.subr.bf16.mxu1 %v334_v1  ;;  %p317_p3 = por %p316_p2, %p315_p1 }
  0x13   :  { %p318_p4 = pnand %p317_p3, %p311_p0 }
  0x14   :  { %282 = vmatpush3.bf16.msra.mxu1 %v304_v10 }
  0x15   :  { %283 = vmatprep.subr.bf16.mxu1 %v334_v1 }
  0x18   :  { %284 = vmatpush3.bf16.msra.mxu1 %v305_v11 }
  0x19   :  { %285 = vmatprep.subr.bf16.mxu1 %v334_v1 }
  0x1c   :  { %286 = vmatpush3.bf16.msra.mxu1 %v306_v12 }
  0x1d   :  { %287 = vmatprep.subr.bf16.mxu1 %v334_v1 }
  0x20   :  { %288 = vmatpush3.bf16.msra.mxu1 %v307_v13 }
  0x83   :  { %v33_v15 = vpop.permute.xlu0 %32 }
  0x84   :  { %v41_v16 = vmul.f32 %v239_v14, %v33_v15 }
  0x86   :  { %v49_v18 = vadd.f32 %v240_v17, %v41_v16 }
  0xdc   :  { %v105_v19 = vpop.f32.mrb[0].mxu0 }
  0xdd   :  { %v106_v20 = vadd.f32 %v105_v19, %v49_v18  ;;  %v271_v21 = vpop.f32.mrb[1].mxu0 }
  0xde   :  { %v108_v22 = vpop.f32.mrb[2].mxu0 }
  0xdf   :  { %308 = vtanh.f32 %v106_v20  ;;  %v272_v23 = vpop.f32.mrb[3].mxu0 }
  0xe9   :  { %v309_v24 = vpop.eup %308 }
  0xea   :  { %v112_v25 = vpack.c.bf16 %v309_v24, %v309_v24 }
  0xec   :  { %290 = vmatmul.mubr.bf16.vlgmr.msra.gmra.mrb[0].mxu1 %v112_v25 }
 0x1bf   :  { %v218_v27 = vpop.f32.mrb[0].mxu1 }
 0x1c0   :  { %v219_v28 = vadd.f32 %v244_v26, %v218_v27  ;;  %v291_v29 = vpop.f32.mrb[1].mxu1 }
 0x1c1   :  { %v221_v30 = vpop.f32.mrb[2].mxu1 }
 0x1c2   :  { %224 = vst.msk [vmem:[#allocation2] sm:$0xff] %vm67_vm1, %v219_v28  ;;  %v292_v31 = vpop.f32.mrb[3].mxu1 }
 0x1c3   :  { %321 = shalt.err (!%p318_p4)
}
 0x1c4   :  { %s322_s6 = scalar_lea.hbm %s444_s7, 128 }
 0x1c5   :  { %p323_p5 = scmp.ne.s32.totalorder %s444_s7, %s322_s6  ;;  %p326_p6 = scmp.lt.u32.totalorder %s322_s6, %s444_s7 }
 0x1c7   :  { %p328_p7 = pnand %p326_p6, %p323_p5 }
 0x1c9   :  { %331 = shalt.err (!%p328_p7)
}
 0x1ca   :  { %234 = dma.vmem_to_hbm [thread:$0]  %s232_s27, 128, %s444_s7, [#allocation3]  }
 0x1cb   :  { %332 = dma.done.wait [#allocation3], 128  }
 0x1cc   :  { %333 = vsyncadd [#allocation3], 4294967168 }
 0x1cd   :  { %238 = vsyncpa [#allocation3], 1 }

</bundles_post_ra>
